<compile_context>
chip_gen: v7x
topology: tpu7x:2x2x1
jax: 0.10.0
libtpu: 0.0.40
codegen_flags: <defaults>
</compile_context>

<pallas_src>
import functools

import jax
import jax.numpy as jnp
from jax.experimental import pallas as pl
from jax.experimental.pallas import tpu as pltpu

BN_EPS = 1e-5
LANE = 128
SUBLANE = 8


def _round_up(v, m):
    return (v + m - 1) // m * m


def mlp_kernel(x_ref, w1_ref, b1_ref, w2_ref, b2_ref, o_ref, *, n_rows):
    # fc1: bf16 operands on the MXU, f32 accumulation; bias + ReLU in f32.
    h = jnp.dot(x_ref[...], w1_ref[...], preferred_element_type=jnp.float32)
    h = jnp.maximum(h + b1_ref[...], 0.0)

    # BatchNorm1d, training-mode batch statistics (batch>1 branch of the
    # PyTorch forward).  Exact stats even with a padded batch: padded rows are
    # masked out of the sums and we divide by the true batch size.
    n_pad = h.shape[0]
    inv_n = 1.0 / float(n_rows)
    if n_pad != n_rows:
        row_ids = jax.lax.broadcasted_iota(jnp.int32, h.shape, 0)
        valid = row_ids < n_rows
        h_sum_src = jnp.where(valid, h, 0.0)
    else:
        valid = None
        h_sum_src = h
    mean = jnp.sum(h_sum_src, axis=0, keepdims=True) * inv_n
    centered = h - mean
    centered_stats = centered if valid is None else jnp.where(valid, centered, 0.0)
    var = jnp.sum(centered_stats * centered_stats, axis=0, keepdims=True) * inv_n
    h = centered * jax.lax.rsqrt(var + BN_EPS)

    # BN affine (gamma, beta) is pre-folded into w2/b2 at param-prep time.
    # Dropout: identity (eval semantics).
    # TODO(synk): training-mode dropout would need pltpu.prng_seed +
    # pltpu.stateful_bernoulli; left as identity for determinism.

    # fc2: bf16 operands on the MXU, f32 accumulation; lane-dense f32 store.
    o_ref[...] = (
        jnp.dot(h.astype(jnp.bfloat16), w2_ref[...],
                preferred_element_type=jnp.float32)
        + b2_ref[...]
    )


def prepare_params(params):
    """One-time prep: fold BN affine into fc2, pad feature axes to 128, cast
    weights to bf16.  Keep this OFF the per-call path."""
    w1, b1, gamma, beta, w2, b2 = params
    in_dim, hidden_dim = w1.shape
    out_dim = w2.shape[1]
    in_p = _round_up(in_dim, LANE)
    hid_p = _round_up(hidden_dim, LANE)
    out_p = _round_up(out_dim, LANE)

    # Fold BN affine into fc2 (in f32, before the bf16 cast).
    w2_fold = w2 * gamma.reshape(hidden_dim, 1)
    b2_fold = beta @ w2 + b2

    w1p = jnp.pad(w1, ((0, in_p - in_dim), (0, hid_p - hidden_dim))).astype(jnp.bfloat16)
    b1p = jnp.pad(b1, ((0, 0), (0, hid_p - hidden_dim)))
    w2p = jnp.pad(w2_fold, ((0, hid_p - hidden_dim), (0, out_p - out_dim))).astype(jnp.bfloat16)
    b2p = jnp.pad(b2_fold, ((0, 0), (0, out_p - out_dim)))
    return w1p, b1p, w2p, b2p


@functools.partial(jax.jit, static_argnames=("out_dim",))
def mlp_forward(x, w1p, b1p, w2p, b2p, *, out_dim):
    n, in_dim = x.shape
    in_p, hid_p = w1p.shape
    out_p = w2p.shape[1]
    n_p = _round_up(max(n, SUBLANE), SUBLANE)

    # Only x is padded/cast on the hot path (bf16 halves the x DMA).
    xp = jnp.pad(x, ((0, n_p - n), (0, in_p - in_dim))).astype(jnp.bfloat16)

    bytes_accessed = (
        xp.size * 2 + w1p.size * 2 + w2p.size * 2
        + (b1p.size + b2p.size) * 4
        + n_p * out_p * 4
    )
    cost = pl.CostEstimate(
        flops=2 * n_p * (in_p * hid_p + hid_p * out_p),
        transcendentals=hid_p,  # one rsqrt per hidden feature
        bytes_accessed=bytes_accessed,
    )

    # Resident footprint: inputs + output + a few live (n_p, hid_p) f32 values.
    resident = bytes_accessed + 4 * n_p * hid_p * 4
    vmem_limit = int(min(max(2 * resident, 4 * 1024 * 1024), 64 * 1024 * 1024))

    full = lambda shape: pl.BlockSpec(shape, lambda: (0,) * len(shape))
    out_padded = pl.pallas_call(
        functools.partial(mlp_kernel, n_rows=n),
        out_shape=jax.ShapeDtypeStruct((n_p, out_p), jnp.float32),
        grid=(),
        in_specs=[
            full(xp.shape),
            full(w1p.shape),
            full(b1p.shape),
            full(w2p.shape),
            full(b2p.shape),
        ],
        out_specs=full((n_p, out_p)),
        cost_estimate=cost,
        compiler_params=pltpu.CompilerParams(vmem_limit_bytes=vmem_limit),
    )(xp, w1p, b1p, w2p, b2p)

    # Slice the lane-dense slab back to the logical shape.
    return out_padded[:n, :out_dim]


def init_params(key, in_dim, hidden_dim, out_dim):
    k1, k2, k3, k4 = jax.random.split(key, 4)
    # Mimic nn.Linear default init: U(-1/sqrt(fan_in), 1/sqrt(fan_in)).
    lim1 = 1.0 / jnp.sqrt(in_dim)
    lim2 = 1.0 / jnp.sqrt(hidden_dim)
    w1 = jax.random.uniform(k1, (in_dim, hidden_dim), jnp.float32, -lim1, lim1)
    b1 = jax.random.uniform(k2, (1, hidden_dim), jnp.float32, -lim1, lim1)
    w2 = jax.random.uniform(k3, (hidden_dim, out_dim), jnp.float32, -lim2, lim2)
    b2 = jax.random.uniform(k4, (1, out_dim), jnp.float32, -lim2, lim2)
    # BatchNorm1d affine params: gamma=1, beta=0.
    gamma = jnp.ones((1, hidden_dim), jnp.float32)
    beta = jnp.zeros((1, hidden_dim), jnp.float32)
    return w1, b1, gamma, beta, w2, b2


def reference_forward(x, params):
    # Same math as the kernel (bf16 matmul operands, f32 accumulate, f32 BN,
    # BN affine folded into fc2).
    w1, b1, gamma, beta, w2, b2 = params
    h = jnp.dot(x.astype(jnp.bfloat16), w1.astype(jnp.bfloat16),
                preferred_element_type=jnp.float32) + b1
    h = jnp.maximum(h, 0.0)
    mean = jnp.mean(h, axis=0, keepdims=True)
    var = jnp.mean((h - mean) ** 2, axis=0, keepdims=True)
    hn = (h - mean) * jax.lax.rsqrt(var + BN_EPS)
    w2f = (w2 * gamma.reshape(-1, 1)).astype(jnp.bfloat16)
    b2f = beta @ w2 + b2
    return jnp.dot(hn.astype(jnp.bfloat16), w2f,
                   preferred_element_type=jnp.float32) + b2f


if __name__ == "__main__":
    key = jax.random.PRNGKey(0)
    kx, kp = jax.random.split(key)

    # TODO(synk): the PyTorch module switches to eval-mode BN (running stats)
    # when batch size == 1; this kernel implements the batch>1 branch only,
    # and dropout is identity (eval / p=0 semantics).
    N, IN_DIM, HIDDEN_DIM, OUT_DIM = 8, 16, 32, 8
    x = jax.random.normal(kx, (N, IN_DIM), jnp.float32)
    params = init_params(kp, IN_DIM, HIDDEN_DIM, OUT_DIM)

    # One-time param prep (off the per-call path).
    w1p, b1p, w2p, b2p = prepare_params(params)

    out = jax.block_until_ready(
        mlp_forward(x, w1p, b1p, w2p, b2p, out_dim=OUT_DIM))

    ref = reference_forward(x, params)
    assert out.shape == (N, OUT_DIM)
    assert jnp.allclose(out, ref, atol=2e-3, rtol=2e-3), float(
        jnp.max(jnp.abs(out - ref))
    )

    # Sanity check against a pure-f32 unfused reference (looser tolerance:
    # bf16 MXU operands are an intentional numerics change).
    w1, b1, gamma, beta, w2, b2 = params
    h32 = jnp.maximum(x @ w1 + b1, 0.0)
    m32 = jnp.mean(h32, axis=0, keepdims=True)
    v32 = jnp.mean((h32 - m32) ** 2, axis=0, keepdims=True)
    ref32 = ((h32 - m32) * jax.lax.rsqrt(v32 + BN_EPS) * gamma + beta) @ w2 + b2
    assert jnp.allclose(out, ref32, atol=5e-2, rtol=5e-2), float(
        jnp.max(jnp.abs(out - ref32))
    )

    print("KERNEL_OK")
</pallas_src>

<mosaic_0001>
module attributes {stable_mosaic.version = 11 : i64} {
  func.func @mlp_kernel(%arg0: memref<8x128xbf16, #tpu.memory_space<vmem>>, %arg1: memref<128x128xbf16, #tpu.memory_space<vmem>>, %arg2: memref<1x128xf32, #tpu.memory_space<vmem>>, %arg3: memref<128x128xbf16, #tpu.memory_space<vmem>>, %arg4: memref<1x128xf32, #tpu.memory_space<vmem>>, %arg5: memref<8x128xf32, #tpu.memory_space<vmem>>) attributes {dimension_semantics = [], scalar_prefetch = 0 : i64, scratch_operands = 0 : i64, tpu.core_type = #tpu.core_type<tc>} {
    %c0 = arith.constant 0 : index
    %c0_0 = arith.constant 0 : index
    %0 = vector.load %arg0[%c0, %c0_0] : memref<8x128xbf16, #tpu.memory_space<vmem>>, vector<8x128xbf16>
    %c0_1 = arith.constant 0 : index
    %c0_2 = arith.constant 0 : index
    %1 = vector.load %arg1[%c0_1, %c0_2] : memref<128x128xbf16, #tpu.memory_space<vmem>>, vector<128x128xbf16>
    %cst = arith.constant dense<0.000000e+00> : vector<8x128xf32>
    %2 = tpu.matmul %0, %1, %cst {dimension_numbers = #tpu.dot_dimension_numbers<[1], [0], [0], [1], [0, 0, 1, 1], [], []>} : vector<8x128xbf16>, vector<128x128xbf16>, vector<8x128xf32> -> vector<8x128xf32>
    %c0_3 = arith.constant 0 : index
    %c0_4 = arith.constant 0 : index
    %3 = vector.load %arg2[%c0_3, %c0_4] : memref<1x128xf32, #tpu.memory_space<vmem>>, vector<1x128xf32>
    %4 = vector.broadcast %3 : vector<1x128xf32> to vector<8x128xf32>
    %5 = arith.addf %2, %4 : vector<8x128xf32>
    %cst_5 = arith.constant 0.000000e+00 : f32
    %6 = vector.broadcast %cst_5 : f32 to vector<8x128xf32>
    %7 = arith.maximumf %5, %6 : vector<8x128xf32>
    %cst_6 = arith.constant dense<0.000000e+00> : vector<128xf32>
    %8 = vector.multi_reduction <add>, %7, %cst_6 [0] : vector<8x128xf32> to vector<128xf32>
    %9 = vector.shape_cast %8 : vector<128xf32> to vector<1x128xf32>
    %cst_7 = arith.constant 1.250000e-01 : f32
    %10 = vector.broadcast %cst_7 : f32 to vector<1x128xf32>
    %11 = arith.mulf %9, %10 : vector<1x128xf32>
    %12 = vector.broadcast %11 : vector<1x128xf32> to vector<8x128xf32>
    %13 = arith.subf %7, %12 : vector<8x128xf32>
    %14 = arith.mulf %13, %13 : vector<8x128xf32>
    %cst_8 = arith.constant dense<0.000000e+00> : vector<128xf32>
    %15 = vector.multi_reduction <add>, %14, %cst_8 [0] : vector<8x128xf32> to vector<128xf32>
    %16 = vector.shape_cast %15 : vector<128xf32> to vector<1x128xf32>
    %cst_9 = arith.constant 1.250000e-01 : f32
    %17 = vector.broadcast %cst_9 : f32 to vector<1x128xf32>
    %18 = arith.mulf %16, %17 : vector<1x128xf32>
    %cst_10 = arith.constant 9.99999974E-6 : f32
    %19 = vector.broadcast %cst_10 : f32 to vector<1x128xf32>
    %20 = arith.addf %18, %19 : vector<1x128xf32>
    %21 = math.rsqrt %20 : vector<1x128xf32>
    %22 = vector.broadcast %21 : vector<1x128xf32> to vector<8x128xf32>
    %23 = arith.mulf %13, %22 : vector<8x128xf32>
    %24 = arith.truncf %23 : vector<8x128xf32> to vector<8x128xbf16>
    %c0_11 = arith.constant 0 : index
    %c0_12 = arith.constant 0 : index
    %25 = vector.load %arg3[%c0_11, %c0_12] : memref<128x128xbf16, #tpu.memory_space<vmem>>, vector<128x128xbf16>
    %cst_13 = arith.constant dense<0.000000e+00> : vector<8x128xf32>
    %26 = tpu.matmul %24, %25, %cst_13 {dimension_numbers = #tpu.dot_dimension_numbers<[1], [0], [0], [1], [0, 0, 1, 1], [], []>} : vector<8x128xbf16>, vector<128x128xbf16>, vector<8x128xf32> -> vector<8x128xf32>
    %c0_14 = arith.constant 0 : index
    %c0_15 = arith.constant 0 : index
    %27 = vector.load %arg4[%c0_14, %c0_15] : memref<1x128xf32, #tpu.memory_space<vmem>>, vector<1x128xf32>
    %28 = vector.broadcast %27 : vector<1x128xf32> to vector<8x128xf32>
    %29 = arith.addf %26, %28 : vector<8x128xf32>
    %c0_16 = arith.constant 0 : index
    %c0_17 = arith.constant 0 : index
    %30 = vector.load %arg5[%c0_16, %c0_17] : memref<8x128xf32, #tpu.memory_space<vmem>>, vector<8x128xf32>
    tpu.vector_store %arg5[%c0_16, %c0_17], %29 {strides = array<i32>} : memref<8x128xf32, #tpu.memory_space<vmem>>, vector<8x128xf32>,
    return
  }
}

</mosaic_0001>

<bundles_post_ra>
// kernel: mlp_forward.1
= control target key start
LH: loop header
LB: loop body
LE: loop exit
PB: predicated region body
PF: predicated region fallthrough
CT: control target
= control target key end

     0   :  { %10 = vsyncpa [#allocation3], 0  ;;  %s566_s0 = inlined_call_operand.vmem [shape: bf16[8,128], index: 0, kind: input, shape index: {}]   ;;  %s567_s1 = inlined_call_operand.hbm [shape: bf16[128,128], index: 1, kind: input, shape index: {}]   ;;  %s568_s2 = inlined_call_operand.vmem [shape: f32[1,128], index: 2, kind: input, shape index: {}]   ;;  %s569_s3 = inlined_call_operand.hbm [shape: bf16[128,128], index: 3, kind: input, shape index: {}]   ;;  %s570_s4 = inlined_call_operand.vmem [shape: f32[1,128], index: 4, kind: input, shape index: {}]   ;;  %s571_s5 = inlined_call_operand.hbm [shape: f32[8,128], index: 5, kind: output, shape index: {}]  }
   0x1   :  { %11 = vsyncpa [#allocation6], 0 }
   0x2   :  { %12 = vsyncpa [#allocation4], 0  ;;  %s484_s18 = smov [#allocation2]   ;;  %s412_s22 = scalar_lea.hbm %s567_s1, 1024 }
   0x3   :  { %s20_s19 = sshll.u32 %s484_s18, 4  ;;  %p413_p0 = scmp.ne.s32.totalorder %s567_s1, %s412_s22  ;;  %s21_s19 = int_to_ptr.vmem [resolvable:$true] %s20_s19 }
   0x4   :  { %p416_p1 = scmp.lt.u32.totalorder %s412_s22, %s567_s1 }
   0x6   :  { %p418_p2 = pnand %p416_p1, %p413_p0 }
   0x8   :  { %421 = shalt.err (!%p418_p2)
}
   0x9   :  { %s422_s27 = scalar_lea.vmem %s21_s19, 1024  ;;  %p427_p4 = scmp.lt.s32.totalorder %s21_s19, %s21_s19 }
   0xa   :  { %p423_p3 = scmp.ne.s32.totalorder %s21_s19, %s422_s27  ;;  %p428_p5 = scmp.lt.s32.totalorder %s422_s27, %s422_s27 }
   0xc   :  { %p429_p6 = por %p428_p5, %p427_p4 }
   0xe   :  { %p430_p7 = pnand %p429_p6, %p423_p3 }
  0x10   :  { %433 = shalt.err (!%p430_p7)
}
  0x11   :  { %s485_s28 = smov 64   ;;  %s486_s29 = smov 4  }
  0x12   :  { %26 = dma.hbm_to_vmem [thread:$0]  %s567_s1, 1024, %s21_s19, [#allocation3], %s485_s28, %s485_s28, %s486_s29  }
  0x13   :  { %s487_s7 = smov [#allocation5]   ;;  %s434_s11 = scalar_lea.hbm %s569_s3, 1024 }
  0x14   :  { %s34_s8 = sshll.u32 %s487_s7, 4  ;;  %p435_p8 = scmp.ne.s32.totalorder %s569_s3, %s434_s11  ;;  %s35_s8 = int_to_ptr.vmem [resolvable:$true] %s34_s8 }
  0x15   :  { %p438_p9 = scmp.lt.u32.totalorder %s434_s11, %s569_s3 }
  0x17   :  { %p440_p10 = pnand %p438_p9, %p435_p8 }
  0x19   :  { %443 = shalt.err (!%p440_p10)
}
  0x1a   :  { %s444_s16 = scalar_lea.vmem %s35_s8, 1024  ;;  %p449_p12 = scmp.lt.s32.totalorder %s35_s8, %s35_s8 }
  0x1b   :  { %p445_p11 = scmp.ne.s32.totalorder %s35_s8, %s444_s16  ;;  %p450_p13 = scmp.lt.s32.totalorder %s444_s16, %s444_s16 }
  0x1d   :  { %p451_p0 = por %p450_p13, %p449_p12 }
  0x1f   :  { %p452_p1 = pnand %p451_p0, %p445_p11 }
  0x21   :  { %455 = shalt.err (!%p452_p1)
}
  0x22   :  { %40 = dma.hbm_to_vmem [thread:$0]  %s569_s3, 1024, %s35_s8, [#allocation6], %s485_s28, %s485_s28, %s486_s29  }
  0x23   :  { %478 = dma.done.wait [#allocation3], 1024  }
  0x24   :  { %479 = vsyncadd [#allocation3], 4294966272 }
  0x25   :  { %480 = dma.done.wait [#allocation6], 1024  }
  0x26   :  { %481 = vsyncadd [#allocation6], 4294966272  ;;  %v488_v0 = vmov 0.0   ;;  %vm489_vm0 = vmmov 0   ;;  %v394_v1 = vld [vmem:[#allocation2] sm:$0xff]   ;;  %v395_v2 = vld [vmem:[#allocation2 + $0x8] sm:$0xff]  }
  0x27   :  { %347 = vmatprep.subr.bf16.mxu0 %v488_v0  ;;  %363 = vmatprep.mubr.msk.bf16.mxu0 %vm489_vm0, %v488_v0  ;;  %v396_v3 = vld [vmem:[#allocation2 + $0x10] sm:$0xff]   ;;  %v397_v4 = vld [vmem:[#allocation2 + $0x18] sm:$0xff]   ;;  %v398_v5 = vld [vmem:[#allocation2 + $0x20] sm:$0xff]   ;;  %s490_s21 = smov [#allocation7]  }
  0x28   :  { %367 = vmatprep.subr.bf16.mxu1 %v488_v0  ;;  %383 = vmatprep.mubr.msk.bf16.mxu1 %vm489_vm0, %v488_v0  ;;  %v399_v6 = vld [vmem:[#allocation2 + $0x28] sm:$0xff]   ;;  %v400_v7 = vld [vmem:[#allocation2 + $0x30] sm:$0xff]   ;;  %v401_v8 = vld [vmem:[#allocation2 + $0x38] sm:$0xff]   ;;  %s301_s22 = sshll.u32 %s490_s21, 4  ;;  %s302_s22 = int_to_ptr.vmem [resolvable:$true] %s301_s22 }
  0x29   :  { %348 = vmatpush3.bf16.msra.mxu0 %v394_v1  ;;  %v50_v9 = vld [vmem:[%s566_s0] sm:$0xf]  ;;  %v402_v10 = vld [vmem:[#allocation5] sm:$0xff]   ;;  %v403_v11 = vld [vmem:[#allocation5 + $0x8] sm:$0xff]   ;;  %s456_s23 = scalar_lea.vmem %s302_s22, 128  ;;  %p461_p3 = scmp.lt.s32.totalorder %s302_s22, %s302_s22 }
  0x2a   :  { %349 = vmatprep.subr.bf16.mxu0 %v488_v0  ;;  %368 = vmatpush3.bf16.msra.mxu1 %v402_v10  ;;  %v404_v12 = vld [vmem:[#allocation5 + $0x10] sm:$0xff]   ;;  %v405_v13 = vld [vmem:[#allocation5 + $0x18] sm:$0xff]   ;;  %v406_v14 = vld [vmem:[#allocation5 + $0x20] sm:$0xff]   ;;  %p457_p2 = scmp.ne.s32.totalorder %s302_s22, %s456_s23  ;;  %p462_p4 = scmp.lt.s32.totalorder %s456_s23, %s456_s23 }
  0x2b   :  { %369 = vmatprep.subr.bf16.mxu1 %v488_v0  ;;  %v407_v15 = vld [vmem:[#allocation5 + $0x28] sm:$0xff]   ;;  %v408_v16 = vld [vmem:[#allocation5 + $0x30] sm:$0xff]   ;;  %v409_v17 = vld [vmem:[#allocation5 + $0x38] sm:$0xff]  }
  0x2c   :  { %v311_v18 = vld [vmem:[%s568_s2] ss:$0 sm:$0xff]  ;;  %p463_p5 = por %p462_p4, %p461_p3 }
  0x2d   :  { %350 = vmatpush3.bf16.msra.mxu0 %v395_v2  ;;  %v320_v45 = vld [vmem:[%s570_s4] ss:$0 sm:$0xff] }
  0x2e   :  { %351 = vmatprep.subr.bf16.mxu0 %v488_v0  ;;  %370 = vmatpush3.bf16.msra.mxu1 %v403_v11  ;;  %p464_p6 = pnand %p463_p5, %p457_p2 }
  0x2f   :  { %371 = vmatprep.subr.bf16.mxu1 %v488_v0 }
  0x31   :  { %352 = vmatpush3.bf16.msra.mxu0 %v396_v3 }
  0x32   :  { %353 = vmatprep.subr.bf16.mxu0 %v488_v0  ;;  %372 = vmatpush3.bf16.msra.mxu1 %v404_v12 }
  0x33   :  { %373 = vmatprep.subr.bf16.mxu1 %v488_v0 }
  0x35   :  { %354 = vmatpush3.bf16.msra.mxu0 %v397_v4 }
  0x36   :  { %355 = vmatprep.subr.bf16.mxu0 %v488_v0  ;;  %374 = vmatpush3.bf16.msra.mxu1 %v405_v13 }
  0x37   :  { %375 = vmatprep.subr.bf16.mxu1 %v488_v0 }
  0x39   :  { %356 = vmatpush3.bf16.msra.mxu0 %v398_v5 }
  0x3a   :  { %357 = vmatprep.subr.bf16.mxu0 %v488_v0  ;;  %376 = vmatpush3.bf16.msra.mxu1 %v406_v14 }
  0x3b   :  { %377 = vmatprep.subr.bf16.mxu1 %v488_v0 }
  0x3d   :  { %358 = vmatpush3.bf16.msra.mxu0 %v399_v6 }
  0x3e   :  { %359 = vmatprep.subr.bf16.mxu0 %v488_v0  ;;  %378 = vmatpush3.bf16.msra.mxu1 %v407_v15 }
  0x3f   :  { %379 = vmatprep.subr.bf16.mxu1 %v488_v0 }
  0x41   :  { %360 = vmatpush3.bf16.msra.mxu0 %v400_v7 }
  0x42   :  { %361 = vmatprep.subr.bf16.mxu0 %v488_v0  ;;  %380 = vmatpush3.bf16.msra.mxu1 %v408_v16 }
  0x43   :  { %381 = vmatprep.subr.bf16.mxu1 %v488_v0 }
  0x45   :  { %362 = vmatpush3.bf16.msra.mxu0 %v401_v8 }
  0x46   :  { %382 = vmatpush3.bf16.msra.mxu1 %v409_v17 }
  0x48   :  { %364 = vmatmul.mubr.bf16.vlgmr.msra.gmra.mrb[0].mxu0 %v50_v9 }
 0x11b   :  { %v156_v19 = vpop.f32.mrb[0].mxu0 }
 0x11c   :  { %v157_v20 = vadd.f32 %v311_v18, %v156_v19  ;;  %v365_v21 = vpop.f32.mrb[1].mxu0 }
 0x11d   :  { %v159_v22 = vpop.f32.mrb[2].mxu0 }
 0x11e   :  { %v162_v23 = vmax.f32 %v157_v20, 0.0  ;;  %v366_v24 = vpop.f32.mrb[3].mxu0 }
 0x120   :  { %v163_v25 = vrot.slane %v162_v23, 4 }
 0x122   :  { %v164_v26 = vadd.f32 %v163_v25, %v162_v23 }
 0x124   :  { %v165_v27 = vrot.slane %v164_v26, 2 }
 0x126   :  { %v166_v28 = vadd.f32 %v165_v27, %v164_v26 }
 0x128   :  { %v167_v29 = vrot.slane %v166_v28, 1 }
 0x12a   :  { %v168_v30 = vadd.f32 %v167_v29, %v166_v28 }
 0x12c   :  { %v169_v31 = vmul.f32 0.125, %v168_v30 }
 0x12e   :  { %v170_v32 = vsub.f32 %v162_v23, %v169_v31 }
 0x130   :  { %v171_v33 = vmul.f32 %v170_v32, %v170_v32 }
 0x132   :  { %v172_v34 = vrot.slane %v171_v33, 4 }
 0x134   :  { %v173_v35 = vadd.f32 %v172_v34, %v171_v33 }
 0x136   :  { %v174_v36 = vrot.slane %v173_v35, 2 }
 0x138   :  { %v175_v37 = vadd.f32 %v174_v36, %v173_v35 }
 0x13a   :  { %v176_v38 = vrot.slane %v175_v37, 1 }
 0x13c   :  { %v177_v39 = vadd.f32 %v176_v38, %v175_v37 }
 0x13e   :  { %v178_v40 = vmul.f32 0.125, %v177_v39 }
 0x140   :  { %v179_v41 = vadd.f32 1e-05, %v178_v40 }
 0x142   :  { %410 = vrsqrt.f32 %v179_v41 }
 0x14c   :  { %v411_v42 = vpop.eup %410 }
 0x14d   :  { %v181_v43 = vmul.f32 %v411_v42, %v170_v32 }
 0x14f   :  { %v182_v44 = vpack.c.bf16 %v181_v43, %v181_v43 }
 0x151   :  { %384 = vmatmul.mubr.bf16.vlgmr.msra.gmra.mrb[0].mxu1 %v182_v44 }
 0x224   :  { %v288_v46 = vpop.f32.mrb[0].mxu1 }
 0x225   :  { %v289_v47 = vadd.f32 %v320_v45, %v288_v46  ;;  %v385_v48 = vpop.f32.mrb[1].mxu1 }
 0x226   :  { %v291_v49 = vpop.f32.mrb[2].mxu1 }
 0x227   :  { %294 = vst [vmem:[#allocation7] sm:$0xff] %v289_v47  ;;  %v386_v50 = vpop.f32.mrb[3].mxu1 }
 0x228   :  { %467 = shalt.err (!%p464_p6)
}
 0x229   :  { %s468_s4 = scalar_lea.hbm %s571_s5, 128 }
 0x22a   :  { %p469_p7 = scmp.ne.s32.totalorder %s571_s5, %s468_s4  ;;  %p472_p8 = scmp.lt.u32.totalorder %s468_s4, %s571_s5 }
 0x22c   :  { %p474_p9 = pnand %p472_p8, %p469_p7 }
 0x22e   :  { %477 = shalt.err (!%p474_p9)
}
 0x22f   :  { %304 = dma.vmem_to_hbm [thread:$0]  %s302_s22, 128, %s571_s5, [#allocation4]  }
 0x230   :  { %482 = dma.done.wait [#allocation4], 128  }
 0x231   :  { %483 = vsyncadd [#allocation4], 4294967168 }
 0x232   :  { %308 = vsyncpa [#allocation3], 1 }
 0x233   :  { %309 = vsyncpa [#allocation6], 1 }
 0x234   :  { %310 = vsyncpa [#allocation4], 1 }

</bundles_post_ra>
